<compile_context>
chip_gen: v5e
topology: v5e:2x2
jax: 0.10.0
libtpu: 0.0.40
codegen_flags: <defaults>
</compile_context>

<pallas_src>
import jax
import jax.numpy as jnp
from jax import lax
from jax.experimental import pallas as pl
from jax.experimental.pallas import tpu as pltpu


def linear_kernel(x_ref, w_ref, b_ref, o_ref):
    # x_ref: (TILE_B, IN) f32 VMEM   — row tile of the input batch
    # w_ref: (OUT=1, IN)  f32 VMEM   — PyTorch-layout weight row
    # b_ref: (OUT=1,)     f32 SMEM   — scalar bias
    # o_ref: (OUT=1, TILE_B) f32 VMEM — lane-dense output slab (batch on lanes)
    bias = b_ref[0]  # single scalar read, reused for the whole tile
    # MXU: w_row @ x_tile.T  ==  (x_tile @ w.T).T, contracting over IN.
    y = lax.dot_general(
        w_ref[...],
        x_ref[...],
        dimension_numbers=(((1,), (1,)), ((), ())),
        preferred_element_type=jnp.float32,
    )  # (OUT, TILE_B)
    o_ref[...] = y + bias


def linear_pallas(x, w, b, *, tile_b=1024):
    """PyTorch nn.Linear semantics: x @ w.T + b.

    x: (B, IN), w: (OUT, IN), b: (OUT,)  ->  (B, OUT)   (here OUT == 1)
    """
    B, IN = x.shape
    OUT = w.shape[0]

    if B <= tile_b:
        # Single whole-batch tile (block shapes equal full array dims, so the
        # (8, 128) divisibility constraint does not apply).
        tile = B
        bp = B
    else:
        # Row-tiled grid; tile_b must be a multiple of 128 for lane-dense
        # output blocks and of 8 for the x sublane dim.
        tile = tile_b
        bp = pl.cdiv(B, tile) * tile
        if bp != B:
            x = jnp.pad(x, ((0, bp - B), (0, 0)))

    grid = (bp // tile,)

    cost = pl.CostEstimate(
        flops=2 * bp * IN * OUT,
        transcendentals=0,
        bytes_accessed=(bp * IN + OUT * IN + OUT + bp * OUT) * 4,
    )

    out_t = pl.pallas_call(
        linear_kernel,
        out_shape=jax.ShapeDtypeStruct((OUT, bp), x.dtype),
        grid=grid,
        in_specs=[
            pl.BlockSpec((tile, IN), lambda i: (i, 0)),                 # x row tile
            pl.BlockSpec((OUT, IN), lambda i: (0, 0)),                  # weight row
            pl.BlockSpec(memory_space=pltpu.MemorySpace.SMEM),          # bias scalar
        ],
        out_specs=pl.BlockSpec((OUT, tile), lambda i: (0, i)),          # lane-dense slab
        compiler_params=pltpu.CompilerParams(
            dimension_semantics=("parallel",),   # v7x: both TCs take row tiles
            vmem_limit_bytes=32 * 1024 * 1024,   # explicit headroom, fits all chips
        ),
        cost_estimate=cost,
    )(x, w, b)

    # Back to PyTorch layout (B, OUT); drop any batch padding.
    return out_t[:, :B].T


class SimpleModelPallas:
    """JAX/Pallas port of SimpleModel: a single nn.Linear(10, 1) forward."""

    def __init__(self, key):
        in_features, out_features = 10, 1
        k_w, k_b = jax.random.split(key)
        # Mimic PyTorch's U(-1/sqrt(in), 1/sqrt(in)) init, PyTorch layout.
        bound = 1.0 / jnp.sqrt(jnp.float32(in_features))
        self.w = jax.random.uniform(
            k_w, (out_features, in_features), jnp.float32, -bound, bound
        )
        self.b = jax.random.uniform(
            k_b, (out_features,), jnp.float32, -bound, bound
        )

    def __call__(self, x, *, tile_b=1024):
        # TODO(synk): in a full training setup (optimizer / CosineAnnealingLR
        # from the original file), this tiny linear should be left to XLA
        # fusion inside the jitted step; only large batches warrant Pallas.
        return linear_pallas(x, self.w, self.b, tile_b=tile_b)


if __name__ == "__main__":
    key = jax.random.PRNGKey(0)
    k_param, k_x = jax.random.split(key)

    model = SimpleModelPallas(k_param)

    # Small-shape run consistent with the module: batch=8, features=10.
    x = jax.random.normal(k_x, (8, 10), jnp.float32)
    out = jax.block_until_ready(model(x))
    ref = x @ model.w.T + model.b[None, :]
    assert out.shape == (8, 1)
    assert jnp.allclose(out, ref, atol=1e-5, rtol=1e-5)

    # Exercise the tiled (grid > 1) path with batch padding as well.
    x_big = jax.random.normal(jax.random.PRNGKey(1), (200, 10), jnp.float32)
    out_big = jax.block_until_ready(model(x_big, tile_b=128))
    ref_big = x_big @ model.w.T + model.b[None, :]
    assert out_big.shape == (200, 1)
    assert jnp.allclose(out_big, ref_big, atol=1e-5, rtol=1e-5)

    print("KERNEL_OK")
</pallas_src>

<mosaic_0001>
module attributes {stable_mosaic.version = 11 : i64} {
  func.func @linear_kernel(%arg0: i32, %arg1: memref<8x10xf32, #tpu.memory_space<vmem>>, %arg2: memref<1x10xf32, #tpu.memory_space<vmem>>, %arg3: memref<1xf32, #tpu.memory_space<smem>>, %arg4: memref<1x8xf32, #tpu.memory_space<vmem>>) attributes {dimension_semantics = [#tpu.dimension_semantics<parallel>], iteration_bounds = array<i64: 1>, scalar_prefetch = 0 : i64, scratch_operands = 0 : i64, tpu.core_type = #tpu.core_type<tc>, window_params = [{transform_indices = @transform_0, window_bounds = array<i64: 8, 10>}, {pipeline_mode = #tpu.pipeline_mode<synchronous>, transform_indices = @transform_1, window_bounds = array<i64: 1, 10>}, {transform_indices = @transform_2, window_bounds = array<i64: 1>}, {transform_indices = @transform_3, window_bounds = array<i64: 1, 8>}]} {
    %c0 = arith.constant 0 : index
    %0 = memref.load %arg3[%c0] : memref<1xf32, #tpu.memory_space<smem>>
    %c0_0 = arith.constant 0 : index
    %c0_1 = arith.constant 0 : index
    %1 = vector.load %arg2[%c0_0, %c0_1] : memref<1x10xf32, #tpu.memory_space<vmem>>, vector<1x10xf32>
    %c0_2 = arith.constant 0 : index
    %c0_3 = arith.constant 0 : index
    %2 = vector.load %arg1[%c0_2, %c0_3] : memref<8x10xf32, #tpu.memory_space<vmem>>, vector<8x10xf32>
    %cst = arith.constant dense<0.000000e+00> : vector<1x8xf32>
    %3 = tpu.matmul %1, %2, %cst {dimension_numbers = #tpu.dot_dimension_numbers<[1], [1], [0], [0], [0, 0, 1, 0], [], []>} : vector<1x10xf32>, vector<8x10xf32>, vector<1x8xf32> -> vector<1x8xf32>
    %4 = vector.broadcast %0 : f32 to vector<1x8xf32>
    %5 = arith.addf %3, %4 : vector<1x8xf32>
    %c0_4 = arith.constant 0 : index
    %c0_5 = arith.constant 0 : index
    %6 = vector.load %arg4[%c0_4, %c0_5] : memref<1x8xf32, #tpu.memory_space<vmem>>, vector<1x8xf32>
    tpu.vector_store %arg4[%c0_4, %c0_5], %5 {strides = array<i32>} : memref<1x8xf32, #tpu.memory_space<vmem>>, vector<1x8xf32>,
    return
  }
  func.func @transform_0(%arg0: i32) -> (i32, i32) {
    %c0_i32 = arith.constant 0 : i32
    %c0_i32_0 = arith.constant 0 : i32
    return %arg0, %c0_i32 : i32, i32
  }
  func.func @transform_1(%arg0: i32) -> (i32, i32) {
    %c0_i32 = arith.constant 0 : i32
    %c0_i32_0 = arith.constant 0 : i32
    %c0_i32_1 = arith.constant 0 : i32
    return %c0_i32, %c0_i32_0 : i32, i32
  }
  func.func @transform_2(%arg0: i32) -> i32 {
    %c0_i32 = arith.constant 0 : i32
    %c0_i32_0 = arith.constant 0 : i32
    return %c0_i32 : i32
  }
  func.func @transform_3(%arg0: i32) -> (i32, i32) {
    %c0_i32 = arith.constant 0 : i32
    %c0_i32_0 = arith.constant 0 : i32
    return %c0_i32, %arg0 : i32, i32
  }
}

</mosaic_0001>

<bundles_post_ra>
// kernel: tpu_custom_call.1
= control target key start
LH: loop header
LB: loop body
LE: loop exit
PB: predicated region body
PF: predicated region fallthrough
CT: control target
= control target key end

     0   :  { %9 = vsyncpa [#allocation4], 0  ;;  %s170_s0 = inlined_call_operand.hbm [shape: f32[8,10], index: 0, kind: input, shape index: {}]   ;;  %s171_s1 = inlined_call_operand.vmem [shape: f32[1,10], index: 1, kind: input, shape index: {}]   ;;  %s172_s2 = inlined_call_operand.<no memory space> [shape: f32[1], index: 2, kind: input, shape index: {}]   ;;  %s173_s3 = inlined_call_operand.hbm [shape: f32[1,8], index: 3, kind: output, shape index: {}]  }
   0x1   :  { %10 = vsyncpa [#allocation5], 0  ;;  %s16_s14 = sshll.u32 %s170_s0, 4  ;;  %s136_s15 = smov [#allocation3]   ;;  %s17_s14 = int_to_ptr.hbm [resolvable:$true] %s16_s14 }
   0x2   :  { %s18_s16 = sshll.u32 %s136_s15, 4  ;;  %s19_s16 = int_to_ptr.vmem [resolvable:$true] %s18_s16 }
   0x3   :  { %21 = dma.hbm_to_vmem [thread:$0]  %s17_s14, 128, %s19_s16, [#allocation4]  }
   0x4   :  { %132 = dma.done.wait [#allocation4], 128  }
   0x5   :  { %133 = vsyncadd [#allocation4], 4294967168  ;;  %vm34_vm0 = vcmask 80896   ;;  %v32_v0 = vld [vmem:[#allocation3] sm:$0xff]  ;;  %v33_v2 = vstv %s172_s2  ;;  %s137_s0 = smov [#allocation6]   ;;  %s70_s24 = sshll.u32 %s173_s3, 4  ;;  %s71_s24 = int_to_ptr.hbm [resolvable:$true] %s70_s24 }
   0x6   :  { %80 = vmatpush.xpose.msk.msra.mxu0 %vm34_vm0, %v32_v0  ;;  %v31_v1 = vld [vmem:[%s171_s1] sm:$0x1]  ;;  %s68_s21 = sshll.u32 %s137_s0, 4  ;;  %vm61_vm1 = vcmask 57344   ;;  %s69_s21 = int_to_ptr.vmem [resolvable:$true] %s68_s21 }
   0x9   :  { %81 = vmatmul.msk.f32.vlgmr.msra.gmra.mxu0 %vm34_vm0, %v31_v1 }
  0x86   :  { %v58_v3 = vpop.f32.mrf.mxu0 }
  0x87   :  { %v59_v4 = vadd.f32 %v58_v3, %v33_v2 }
  0x89   :  { %62 = vst.msk [vmem:[#allocation6] sm:$0x1] %vm61_vm1, %v59_v4 }
  0x8a   :  { %73 = dma.vmem_to_hbm [thread:$0]  %s69_s21, 16, %s71_s24, [#allocation5]  }
  0x8b   :  { %134 = dma.done.wait [#allocation5], 16  }
  0x8c   :  { %135 = vsyncadd [#allocation5], 4294967280 }
  0x8d   :  { %78 = vsyncpa [#allocation4], 1 }
  0x8e   :  { %79 = vsyncpa [#allocation5], 1 }

</bundles_post_ra>
